<compile_context>
chip_gen: v7x
topology: tpu7x:2x2x1
jax: 0.10.0
libtpu: 0.0.40
codegen_flags: <defaults>
</compile_context>

<pallas_src>
import jax
import jax.numpy as jnp
import numpy as np
from jax.experimental import pallas as pl
from jax.experimental.pallas import tpu as pltpu


def timepred_kernel(tl_ref,            # (1,) f32 in SMEM: time_length
                    x_ref,             # (TB, E+D)  = [prior_embed | ob_m]
                    w1_ref, b1_ref,    # (E+D, 2H), (1, 2H)   (ob2embed folded in)
                    w2t_ref, b2t_ref,  # (2, 2H),  (2, 1)     block-diag heads, transposed
                    out_ref):          # (2, TB)   row0 = st, row1 = ed  (lane-dense)
    x = x_ref[...]

    # Layer 1 of BOTH branches, ob2embed folded in:
    #   h = relu([prior | ob] @ [[W1a],[W_ob@W1b]] + (b1 + b_ob@W1b))
    h = jnp.dot(x, w1_ref[...], preferred_element_type=jnp.float32) + b1_ref[...]
    h = jnp.maximum(h, 0.0)                                    # (TB, 2H)

    # Fused heads computed transposed (NT dot, q@k^T-style) so the result is
    # already (2, TB) and the store is a single unmasked full-width write.
    z_t = jax.lax.dot_general(
        w2t_ref[...], h,
        dimension_numbers=(((1,), (1,)), ((), ())),
        preferred_element_type=jnp.float32) + b2t_ref[...]     # (2, TB)

    st = jax.nn.softplus(z_t[0:1, :])                          # (1, TB)
    dur = jax.nn.sigmoid(z_t[1:2, :])                          # (1, TB)
    ed = st + dur * tl_ref[0]
    out_ref[...] = jnp.concatenate([st, ed], axis=0)           # (2, TB) full store


def _fuse_params(p, prior_embed_dim):
    """One-time wrapper-side weight fusion (pure-JAX glue, runs once)."""
    E = prior_embed_dim
    H = p["w1s"].shape[1]
    # Column-fuse the st/dur first layers:  cat(prior, ob_embed) @ [W1_st | W1_dur]
    w1a = jnp.concatenate([p["w1s"][:E], p["w1d"][:E]], axis=1)        # (E, 2H)
    w1b = jnp.concatenate([p["w1s"][E:], p["w1d"][E:]], axis=1)        # (E, 2H)
    # Fold ob2embed (purely linear) into layer 1.
    w1 = jnp.concatenate([w1a, p["w_ob"] @ w1b], axis=0)               # (E+D, 2H)
    b1 = (jnp.concatenate([p["b1s"], p["b1d"]], axis=1)
          + p["b_ob"] @ w1b)                                           # (1, 2H)
    # Block-diagonal fused heads, stored transposed: (2, 2H) and (2, 1).
    zeros = jnp.zeros((1, H), jnp.float32)
    w2t = jnp.concatenate(
        [jnp.concatenate([p["w2s"].T, zeros], axis=1),
         jnp.concatenate([zeros, p["w2d"].T], axis=1)], axis=0)        # (2, 2H)
    b2t = jnp.concatenate([p["b2s"], p["b2d"]], axis=0)                # (2, 1)
    return w1, b1, w2t, b2t


def _pick_batch_tile(B, tb_req):
    """Largest sensible batch tile.

    Small batches: one block covering the whole (8-rounded) batch.
    Large batches: tiles that are multiples of 128 so the (2, tb) output
    blocks stay lane-dense; with the default tb=2048 any batch > 2048 yields
    >= 2 'parallel' blocks, which keeps both v7x TensorCores fed.
    """
    b8 = 8 * pl.cdiv(B, 8)
    if b8 <= tb_req:
        return b8, b8, 1
    tb = max(128, 128 * (tb_req // 128))
    n = pl.cdiv(B, tb)
    return tb, n * tb, n


def timepred_forward(prior_embed, ob_m, params, time_length=1.0, tb=2048):
    B, E = prior_embed.shape
    D = ob_m.shape[1]
    w1, b1, w2t, b2t = _fuse_params(params, E)
    ED, H2 = w1.shape

    tb, Bp, n_blocks = _pick_batch_tile(B, int(tb))

    # Single concatenated activation stream (layout plumbing, one pass).
    x = jnp.concatenate([prior_embed, ob_m], axis=1)                   # (B, E+D)
    if Bp != B:
        x = jnp.pad(x, ((0, Bp - B), (0, 0)))                          # pad once, one array

    tl = jnp.asarray([time_length], jnp.float32)                       # lives in SMEM

    wgt = lambda shape: pl.BlockSpec(shape, lambda i: (0, 0))          # VMEM-resident
    in_specs = [
        pl.BlockSpec(memory_space=pltpu.MemorySpace.SMEM),             # time_length
        pl.BlockSpec((tb, ED), lambda i: (i, 0)),                      # activations
        wgt((ED, H2)), wgt((1, H2)),                                   # fused layer 1
        wgt((2, H2)), wgt((2, 1)),                                     # fused heads
    ]
    out_specs = pl.BlockSpec((2, tb), lambda i: (0, i))                # lane-dense blocks

    # Raise the scoped VMEM limit only if the double-buffered tiles need it
    # (keeps headroom on v7x: 64 MiB physical / 32 MiB default scoped).
    est = (2 * (tb * ED + 2 * tb) * 4
           + 2 * (ED * H2 + H2 + 2 * H2 + 2) * 4 + (2 << 20))
    vmem_limit = min(est, 48 << 20) if est > (16 << 20) else None

    out = pl.pallas_call(
        timepred_kernel,
        out_shape=jax.ShapeDtypeStruct((2, Bp), jnp.float32),
        grid=(n_blocks,),
        in_specs=in_specs,
        out_specs=out_specs,
        compiler_params=pltpu.CompilerParams(
            dimension_semantics=("parallel",),                         # megacore shard (v7x)
            vmem_limit_bytes=vmem_limit),
    )(tl, x, w1, b1, w2t, b2t)

    # torch.stack((st_pred, ed_pred)) -> (2, B); output is already (2, Bp),
    # just trim the batch padding (no wrapper transpose needed).
    return out[:, :B]


def make_params(key, prior_embed_dim, ob_dim, hidden):
    """Deterministic synthetic weights in (in, out) layout (stand-in for weights_init)."""
    E, D, H = prior_embed_dim, ob_dim, hidden
    ks = jax.random.split(key, 10)
    s = 0.1
    w = lambda k, shape: jax.random.normal(k, shape, jnp.float32) * s
    return {
        # ob2embed: Linear(D -> E)
        "w_ob": w(ks[0], (D, E)), "b_ob": w(ks[1], (1, E)),
        # st_pred MLP: Linear(2E -> H) relu, Linear(H -> 1) softplus
        "w1s": w(ks[2], (2 * E, H)), "b1s": w(ks[3], (1, H)),
        "w2s": w(ks[4], (H, 1)),     "b2s": w(ks[5], (1, 1)),
        # dur_pred MLP: Linear(2E -> H) relu, Linear(H -> 1) sigmoid
        "w1d": w(ks[6], (2 * E, H)), "b1d": w(ks[7], (1, H)),
        "w2d": w(ks[8], (H, 1)),     "b2d": w(ks[9], (1, 1)),
    }


def timepred_reference(prior_embed, ob_m, p, time_length=1.0):
    """Pure-JAX reference replicating the PyTorch forward."""
    ob_embed = ob_m @ p["w_ob"] + p["b_ob"]
    x = jnp.concatenate([prior_embed, ob_embed], axis=-1)
    h_st = jnp.maximum(x @ p["w1s"] + p["b1s"], 0.0)
    st = jax.nn.softplus(h_st @ p["w2s"] + p["b2s"])[:, 0]
    h_d = jnp.maximum(x @ p["w1d"] + p["b1d"], 0.0)
    dur = jax.nn.sigmoid(h_d @ p["w2d"] + p["b2d"])[:, 0]
    ed = st + dur * time_length
    return jnp.stack((st, ed))


if __name__ == "__main__":
    B, E, D, H = 64, 8, 16, 32          # batch, prior_embed_dim, ob_dim, hidden
    time_length = 1.0

    key = jax.random.PRNGKey(0)
    k_prior, k_ob, k_par = jax.random.split(key, 3)
    prior_embed = jax.random.normal(k_prior, (B, E), jnp.float32)
    ob_m = jax.random.normal(k_ob, (B, D), jnp.float32)
    params = make_params(k_par, E, D, H)

    out = timepred_forward(prior_embed, ob_m, params, time_length)
    out = jax.block_until_ready(out)

    ref = timepred_reference(prior_embed, ob_m, params, time_length)
    assert out.shape == (2, B), out.shape
    np.testing.assert_allclose(np.asarray(out), np.asarray(ref), rtol=1e-5, atol=1e-5)
    print("KERNEL_OK")
</pallas_src>

<mosaic_0001>
module attributes {stable_mosaic.version = 11 : i64} {
  func.func @timepred_kernel(%arg0: i32, %arg1: memref<1xf32, #tpu.memory_space<smem>>, %arg2: memref<64x24xf32, #tpu.memory_space<vmem>>, %arg3: memref<24x64xf32, #tpu.memory_space<vmem>>, %arg4: memref<1x64xf32, #tpu.memory_space<vmem>>, %arg5: memref<2x64xf32, #tpu.memory_space<vmem>>, %arg6: memref<2x1xf32, #tpu.memory_space<vmem>>, %arg7: memref<2x64xf32, #tpu.memory_space<vmem>>) attributes {dimension_semantics = [#tpu.dimension_semantics<parallel>], iteration_bounds = array<i64: 1>, scalar_prefetch = 0 : i64, scratch_operands = 0 : i64, tpu.core_type = #tpu.core_type<tc>, window_params = [{transform_indices = @transform_0, window_bounds = array<i64: 1>}, {transform_indices = @transform_1, window_bounds = array<i64: 64, 24>}, {pipeline_mode = #tpu.pipeline_mode<synchronous>, transform_indices = @transform_2, window_bounds = array<i64: 24, 64>}, {pipeline_mode = #tpu.pipeline_mode<synchronous>, transform_indices = @transform_3, window_bounds = array<i64: 1, 64>}, {pipeline_mode = #tpu.pipeline_mode<synchronous>, transform_indices = @transform_4, window_bounds = array<i64: 2, 64>}, {pipeline_mode = #tpu.pipeline_mode<synchronous>, transform_indices = @transform_5, window_bounds = array<i64: 2, 1>}, {transform_indices = @transform_6, window_bounds = array<i64: 2, 64>}]} {
    %c0 = arith.constant 0 : index
    %c0_0 = arith.constant 0 : index
    %0 = vector.load %arg2[%c0, %c0_0] : memref<64x24xf32, #tpu.memory_space<vmem>>, vector<64x24xf32>
    %c0_1 = arith.constant 0 : index
    %c0_2 = arith.constant 0 : index
    %1 = vector.load %arg3[%c0_1, %c0_2] : memref<24x64xf32, #tpu.memory_space<vmem>>, vector<24x64xf32>
    %cst = arith.constant dense<0.000000e+00> : vector<64x64xf32>
    %2 = tpu.matmul %0, %1, %cst {dimension_numbers = #tpu.dot_dimension_numbers<[1], [0], [0], [1], [0, 0, 1, 1], [], []>} : vector<64x24xf32>, vector<24x64xf32>, vector<64x64xf32> -> vector<64x64xf32>
    %c0_3 = arith.constant 0 : index
    %c0_4 = arith.constant 0 : index
    %3 = vector.load %arg4[%c0_3, %c0_4] : memref<1x64xf32, #tpu.memory_space<vmem>>, vector<1x64xf32>
    %4 = vector.broadcast %3 : vector<1x64xf32> to vector<64x64xf32>
    %5 = arith.addf %2, %4 : vector<64x64xf32>
    %cst_5 = arith.constant 0.000000e+00 : f32
    %6 = vector.broadcast %cst_5 : f32 to vector<64x64xf32>
    %7 = arith.maximumf %5, %6 : vector<64x64xf32>
    %c0_6 = arith.constant 0 : index
    %c0_7 = arith.constant 0 : index
    %8 = vector.load %arg5[%c0_6, %c0_7] : memref<2x64xf32, #tpu.memory_space<vmem>>, vector<2x64xf32>
    %cst_8 = arith.constant dense<0.000000e+00> : vector<2x64xf32>
    %9 = tpu.matmul %8, %7, %cst_8 {dimension_numbers = #tpu.dot_dimension_numbers<[1], [1], [0], [0], [0, 0, 1, 0], [], []>} : vector<2x64xf32>, vector<64x64xf32>, vector<2x64xf32> -> vector<2x64xf32>
    %c0_9 = arith.constant 0 : index
    %c0_10 = arith.constant 0 : index
    %10 = vector.load %arg6[%c0_9, %c0_10] : memref<2x1xf32, #tpu.memory_space<vmem>>, vector<2x1xf32>
    %11 = vector.broadcast %10 : vector<2x1xf32> to vector<2x64xf32>
    %12 = arith.addf %9, %11 : vector<2x64xf32>
    %13 = vector.extract_strided_slice %12 {offsets = [0, 0], sizes = [1, 64], strides = [1, 1]} : vector<2x64xf32> to vector<1x64xf32>
    %cst_11 = arith.constant 0.000000e+00 : f32
    %14 = vector.broadcast %cst_11 : f32 to vector<1x64xf32>
    %15 = arith.maximumf %13, %14 : vector<1x64xf32>
    %16 = vector.broadcast %cst_11 : f32 to vector<1x64xf32>
    %17 = arith.subf %13, %16 : vector<1x64xf32>
    %18 = arith.cmpf one, %17, %17 : vector<1x64xf32>
    %19 = vector.broadcast %cst_11 : f32 to vector<1x64xf32>
    %20 = arith.addf %13, %19 : vector<1x64xf32>
    %21 = math.absf %17 : vector<1x64xf32>
    %cst_12 = arith.constant 0.000000e+00 : f32
    %22 = vector.broadcast %cst_12 : f32 to vector<1x64xf32>
    %23 = arith.subf %22, %21 : vector<1x64xf32>
    %24 = math.exp %23 : vector<1x64xf32>
    %25 = math.log1p %24 : vector<1x64xf32>
    %26 = arith.addf %15, %25 : vector<1x64xf32>
    %27 = arith.select %18, %20, %26 : vector<1x64xi1>, vector<1x64xf32>
    %28 = vector.extract_strided_slice %12 {offsets = [1, 0], sizes = [1, 64], strides = [1, 1]} : vector<2x64xf32> to vector<1x64xf32>
    %29 = arith.negf %28 : vector<1x64xf32>
    %30 = math.exp %29 : vector<1x64xf32>
    %cst_13 = arith.constant 1.000000e+00 : f32
    %31 = vector.broadcast %cst_13 : f32 to vector<1x64xf32>
    %32 = arith.addf %31, %30 : vector<1x64xf32>
    %33 = arith.divf %31, %32 : vector<1x64xf32>
    %c0_14 = arith.constant 0 : index
    %34 = memref.load %arg1[%c0_14] : memref<1xf32, #tpu.memory_space<smem>>
    %35 = vector.broadcast %34 : f32 to vector<1x64xf32>
    %36 = arith.mulf %33, %35 : vector<1x64xf32>
    %37 = arith.addf %27, %36 : vector<1x64xf32>
    %38 = tpu.concatenate %27, %37 in 0 : vector<1x64xf32>, vector<1x64xf32> -> vector<2x64xf32>
    %c0_15 = arith.constant 0 : index
    %c0_16 = arith.constant 0 : index
    %39 = vector.load %arg7[%c0_15, %c0_16] : memref<2x64xf32, #tpu.memory_space<vmem>>, vector<2x64xf32>
    tpu.vector_store %arg7[%c0_15, %c0_16], %38 {strides = array<i32>} : memref<2x64xf32, #tpu.memory_space<vmem>>, vector<2x64xf32>,
    return
  }
  func.func @transform_0(%arg0: i32) -> i32 {
    %c0_i32 = arith.constant 0 : i32
    %c0_i32_0 = arith.constant 0 : i32
    return %c0_i32 : i32
  }
  func.func @transform_1(%arg0: i32) -> (i32, i32) {
    %c0_i32 = arith.constant 0 : i32
    %c0_i32_0 = arith.constant 0 : i32
    return %arg0, %c0_i32 : i32, i32
  }
  func.func @transform_2(%arg0: i32) -> (i32, i32) {
    %c0_i32 = arith.constant 0 : i32
    %c0_i32_0 = arith.constant 0 : i32
    %c0_i32_1 = arith.constant 0 : i32
    return %c0_i32, %c0_i32_0 : i32, i32
  }
  func.func @transform_3(%arg0: i32) -> (i32, i32) {
    %c0_i32 = arith.constant 0 : i32
    %c0_i32_0 = arith.constant 0 : i32
    %c0_i32_1 = arith.constant 0 : i32
    return %c0_i32, %c0_i32_0 : i32, i32
  }
  func.func @transform_4(%arg0: i32) -> (i32, i32) {
    %c0_i32 = arith.constant 0 : i32
    %c0_i32_0 = arith.constant 0 : i32
    %c0_i32_1 = arith.constant 0 : i32
    return %c0_i32, %c0_i32_0 : i32, i32
  }
  func.func @transform_5(%arg0: i32) -> (i32, i32) {
    %c0_i32 = arith.constant 0 : i32
    %c0_i32_0 = arith.constant 0 : i32
    %c0_i32_1 = arith.constant 0 : i32
    return %c0_i32, %c0_i32_0 : i32, i32
  }
  func.func @transform_6(%arg0: i32) -> (i32, i32) {
    %c0_i32 = arith.constant 0 : i32
    %c0_i32_0 = arith.constant 0 : i32
    return %c0_i32, %arg0 : i32, i32
  }
}

</mosaic_0001>

<bundles_post_ra>
// kernel: tpu_custom_call.1
= control target key start
LH: loop header
LB: loop body
LE: loop exit
PB: predicated region body
PF: predicated region fallthrough
CT: control target
= control target key end

     0   :  { %vm43_vm0 = vcmask 195584   ;;  %s592_s0 = inlined_call_operand.<no memory space> [shape: f32[1], index: 0, kind: input, shape index: {}]   ;;  %s593_s1 = inlined_call_operand.vmem [shape: f32[64,24], index: 1, kind: input, shape index: {}]   ;;  %s594_s2 = inlined_call_operand.vmem [shape: f32[24,64], index: 2, kind: input, shape index: {}]   ;;  %s595_s3 = inlined_call_operand.vmem [shape: f32[1,64], index: 3, kind: input, shape index: {}]   ;;  %s596_s4 = inlined_call_operand.vmem [shape: f32[2,64], index: 4, kind: input, shape index: {}]   ;;  %s597_s5 = inlined_call_operand.vmem [shape: f32[2,1], index: 5, kind: input, shape index: {}]   ;;  %s598_s6 = inlined_call_operand.hbm [shape: f32[2,64], index: 6, kind: output, shape index: {}]  }
   0x1   :  { %v33_v0 = vld [vmem:[%s594_s2] sm:$0xff]  ;;  %v34_v1 = vld [vmem:[%s594_s2 + $0x8] sm:$0xff]  ;;  %v35_v4 = vld [vmem:[%s594_s2 + $0x10] sm:$0xff] }
   0x2   :  { %v414_v2 = vpack.c.bf16 %v34_v1, %v33_v0  ;;  %v25_v3 = vld [vmem:[%s593_s1] sm:$0xff] }
   0x3   :  { %383 = vmatprep.mubr.msk.f32.mxu0 %vm43_vm0, %v25_v3 }
   0x4   :  { %415 = vmatprep.subr.bf16.mxu0 %v414_v2 }
   0x5   :  { %12 = vsyncpa [#allocation4], 0  ;;  %417 = vmatpush3.bf16.msra.mxu0 %v414_v2  ;;  %v26_v5 = vld [vmem:[%s593_s1 + $0x8] sm:$0xff]  ;;  %v27_v6 = vld [vmem:[%s593_s1 + $0x10] sm:$0xff]  ;;  %v472_v12 = vmov 0.0|0.0   ;;  %vm473_vm1 = vmmov 0   ;;  %v311_v63 = vstv %s592_s0 }
   0x6   :  { %381 = vmatprep.subr.mxu0 %v35_v4  ;;  %v28_v7 = vld [vmem:[%s593_s1 + $0x18] sm:$0xff]  ;;  %v29_v8 = vld [vmem:[%s593_s1 + $0x20] sm:$0xff]  ;;  %v30_v9 = vld [vmem:[%s593_s1 + $0x28] sm:$0xff]  ;;  %418 = vmatprep.subr.bf16.mxu1 %v472_v12  ;;  %v474_v13 = vmov 0.0   ;;  %v475_v15 = vmov 0   ;;  %vm188_vm2 = vcmask 523264  }
   0x7   :  { %v31_v10 = vld [vmem:[%s593_s1 + $0x30] sm:$0xff]  ;;  %v32_v11 = vld [vmem:[%s593_s1 + $0x38] sm:$0xff]  ;;  %411 = vmatprep.mubr.msk.f32.mxu1 %vm473_vm1, %v474_v13  ;;  %v182_v14 = vld [vmem:[%s597_s5] sm:$0x3]  ;;  %439 = vset.pattern.permute.xlu0 %v475_v15  ;;  %s476_s22 = smov [#allocation3]   ;;  %vm320_vm6 = vcmask 1040384  }
   0x8   :  { %185 = vperm.xlu0 %439, %v182_v14   ;;  %v338_v16 = vld [vmem:[%s595_s3] ss:$0 sm:$0xff]  ;;  %vm561_vm3 = vmpackc.low %vm188_vm2, %vm188_vm2  ;;  %s330_s23 = sshll.u32 %s476_s22, 4  ;;  %vm322_vm7 = vcmask 517120   ;;  %s331_s23 = int_to_ptr.vmem [resolvable:$true] %s330_s23 }
   0x9   :  { %382 = vmatpush3.msra.mxu0 %v35_v4  ;;  %v181_v46 = vld [vmem:[%s596_s4] sm:$0x3]  ;;  %s448_s0 = scalar_lea.vmem %s331_s23, 32  ;;  %p453_p1 = scmp.lt.s32.totalorder %s331_s23, %s331_s23 }
   0xa   :  { %384 = vmatmul.mubr.msk.f32.vlgmr.msra.gmra.mrb[0].mxu0 %vm43_vm0, %v26_v5  ;;  %p449_p0 = scmp.ne.s32.totalorder %s331_s23, %s448_s0  ;;  %p454_p2 = scmp.lt.s32.totalorder %s448_s0, %s448_s0 }
   0xb   :  { %386 = vmatprep.mubr.msk.f32.mxu0 %vm43_vm0, %v27_v6 }
   0xc   :  { %p455_p3 = por %p454_p2, %p453_p1 }
   0xe   :  { %387 = vmatmul.mubr.msk.f32.gmra.mrb[2].mxu0 %vm43_vm0, %v28_v7  ;;  %p456_p4 = pnand %p455_p3, %p449_p0 }
   0xf   :  { %389 = vmatprep.mubr.msk.f32.mxu0 %vm43_vm0, %v29_v8 }
  0x12   :  { %390 = vmatmul.mubr.msk.f32.gmra.mrb[4].mxu0 %vm43_vm0, %v30_v9 }
  0x13   :  { %392 = vmatprep.mubr.msk.f32.mxu0 %vm43_vm0, %v31_v10 }
  0x16   :  { %393 = vmatmul.mubr.msk.f32.gmra.mrb[6].mxu0 %vm43_vm0, %v32_v11 }
  0x87   :  { %v186_v47 = vpop.permute.xlu0 %185 }
  0xdd   :  { %v385_v17 = vpop.f32.mrb[0].mxu0 }
  0xde   :  { %v140_v18 = vadd.f32 %v385_v17, %v338_v16  ;;  %v134_v19 = vpop.f32.mrb[1].mxu0 }
  0xdf   :  { %v135_v20 = vadd.f32 %v338_v16, %v134_v19 }
  0xe0   :  { %v174_v21 = vmax.f32 %v140_v18, 0.0 }
  0xe1   :  { %v173_v22 = vmax.f32 %v135_v20, 0.0  ;;  %v388_v23 = vpop.f32.mrb[2].mxu0 }
  0xe2   :  { %v150_v24 = vadd.f32 %v388_v23, %v338_v16  ;;  %v144_v25 = vpop.f32.mrb[3].mxu0 }
  0xe3   :  { %v419_v27 = vpack.c.bf16 %v174_v21, %v173_v22  ;;  %v145_v28 = vadd.f32 %v338_v16, %v144_v25 }
  0xe4   :  { %v176_v29 = vmax.f32 %v150_v24, 0.0 }
  0xe5   :  { %v175_v30 = vmax.f32 %v145_v28, 0.0  ;;  %421 = vmatpush3.bf16.xpose.msk.msra.mxu1 %vm561_vm3, %v419_v27  ;;  %v391_v31 = vpop.f32.mrb[4].mxu0 }
  0xe6   :  { %v160_v32 = vadd.f32 %v391_v31, %v338_v16  ;;  %422 = vmatprep.subr.bf16.mxu1 %v472_v12  ;;  %v154_v33 = vpop.f32.mrb[5].mxu0 }
  0xe7   :  { %v423_v34 = vpack.c.bf16 %v176_v29, %v175_v30  ;;  %v155_v35 = vadd.f32 %v338_v16, %v154_v33 }
  0xe8   :  { %v178_v36 = vmax.f32 %v160_v32, 0.0 }
  0xe9   :  { %v177_v37 = vmax.f32 %v155_v35, 0.0  ;;  %v394_v38 = vpop.f32.mrb[6].mxu0 }
  0xea   :  { %v170_v39 = vadd.f32 %v394_v38, %v338_v16  ;;  %v164_v40 = vpop.f32.mrb[7].mxu0 }
  0xeb   :  { %v427_v41 = vpack.c.bf16 %v178_v36, %v177_v37  ;;  %v165_v42 = vadd.f32 %v338_v16, %v164_v40 }
  0xec   :  { %v180_v43 = vmax.f32 %v170_v39, 0.0 }
  0xed   :  { %425 = vmatpush3.bf16.xpose.msk.msra.mxu1 %vm561_vm3, %v423_v34  ;;  %v179_v44 = vmax.f32 %v165_v42, 0.0 }
  0xee   :  { %426 = vmatprep.subr.bf16.mxu1 %v472_v12 }
  0xef   :  { %v431_v45 = vpack.c.bf16 %v180_v43, %v179_v44 }
  0xf5   :  { %429 = vmatpush3.bf16.xpose.msk.msra.mxu1 %vm561_vm3, %v427_v41 }
  0xf6   :  { %430 = vmatprep.subr.bf16.mxu1 %v472_v12 }
  0xfd   :  { %433 = vmatpush3.bf16.xpose.msk.msra.mxu1 %vm561_vm3, %v431_v45 }
 0x104   :  { %412 = vmatmul.mubr.msk.f32.vlgmr.msra.gmra.mrb[0].mxu1 %vm188_vm2, %v181_v46 }
 0x1d7   :  { %v282_v48 = vpop.f32.mrb[0].mxu1 }
 0x1d8   :  { %v283_v49 = vadd.f32 %v282_v48, %v186_v47  ;;  %v413_v50 = vpop.f32.mrb[1].mxu1 }
 0x1da   :  { %v289_v51 = vand.u32 2147483647, %v283_v49  ;;  %v356_v52 = vmul.f32 -1.442695, %v283_v49  ;;  %v286_v4 = vmax.f32 %v283_v49, 0.0  ;;  %vm287_vm5 = vcmp.ne.f32.partialorder %v283_v49, %v283_v49 }
 0x1dc   :  { %v290_v53 = vsub.f32 0.0, %v289_v51  ;;  %440 = vpow2.f32 %v356_v52 }
 0x1de   :  { %v291_v54 = vmul.f32 1.442695, %v290_v53 }
 0x1e0   :  { %442 = vpow2.f32 %v291_v54 }
 0x1e6   :  { %v441_v55 = vpop.eup %440 }
 0x1e7   :  { %v307_v56 = vadd.f32 1.0, %v441_v55 }
 0x1e9   :  { %444 = vrcp.f32 %v307_v56 }
 0x1ea   :  { %v443_v57 = vpop.eup %442 }
 0x1eb   :  { %v293_v58 = vadd.f32 1.0, %v443_v57  ;;  %v296_v59 = vmul.f32 -0.5, %v443_v57  ;;  %v299_v62 = vand.u32 2147483647, %v443_v57 }
 0x1ed   :  { %446 = vlog2.f32 %v293_v58  ;;  %v297_v60 = vadd.f32 1.0, %v296_v59  ;;  %vm300_vm4 = vcmp.lt.f32.partialorder %v299_v62, 0.0004427343 }
 0x1ef   :  { %v298_v2 = vmul.f32 %v443_v57, %v297_v60 }
 0x1f3   :  { %v445_v61 = vpop.eup %444 }
 0x1f4   :  { %v312_v3 = vmul.f32 %v445_v61, %v311_v63 }
 0x1f6   :  { %v314_v7 = vrot.slane %v312_v3, 1 }
 0x1f7   :  { %v447_v0 = vpop.eup %446 }
 0x1f8   :  { %v295_v1 = vmul.f32 0.6931472, %v447_v0 }
 0x1fa   :  { %v301_v5 = vsel %vm300_vm4, %v298_v2, %v295_v1 }
 0x1fb   :  { %v302_v6 = vadd.f32 %v301_v5, %v286_v4 }
 0x1fd   :  { %v303_v8 = vsel %vm287_vm5, %v283_v49, %v302_v6 }
 0x1fe   :  { %v316_v9 = vadd.f32 %v314_v7, %v303_v8 }
 0x200   :  { %v318_v10 = vrot.slane %v316_v9, 7 }
 0x202   :  { %v321_v11 = vsel %vm320_vm6, %v303_v8, %v318_v10 }
 0x203   :  { %323 = vst.msk [vmem:[#allocation3] sm:$0x3] %vm322_vm7, %v321_v11 }
 0x204   :  { %459 = shalt.err (!%p456_p4)
}
 0x205   :  { %s460_s26 = scalar_lea.hbm %s598_s6, 32 }
 0x206   :  { %p461_p5 = scmp.ne.s32.totalorder %s598_s6, %s460_s26  ;;  %p464_p6 = scmp.lt.u32.totalorder %s460_s26, %s598_s6 }
 0x208   :  { %p466_p7 = pnand %p464_p6, %p461_p5 }
 0x20a   :  { %469 = shalt.err (!%p466_p7)
}
 0x20b   :  { %333 = dma.vmem_to_hbm [thread:$0]  %s331_s23, 32, %s598_s6, [#allocation4]  }
 0x20c   :  { %470 = dma.done.wait [#allocation4], 32  }
 0x20d   :  { %471 = vsyncadd [#allocation4], 4294967264 }
 0x20e   :  { %337 = vsyncpa [#allocation4], 1 }

</bundles_post_ra>
